<compile_context>
chip_gen: v7x
topology: tpu7x:2x2x1
jax: 0.10.0
libtpu: 0.0.40
codegen_flags: <defaults>
</compile_context>

<pallas_src>
import functools

import jax
import jax.numpy as jnp
from jax import lax
from jax.experimental import pallas as pl
from jax.experimental.pallas import tpu as pltpu

SUBLANE = 8                          # f32 sublane granularity
LANE = 128                           # lane granularity
VMEM_LIMIT = 32 * 1024 * 1024        # explicit scoped-VMEM limit (safe on v5e/v6e/v7x)
VMEM_TILE_BUDGET = 8 * 1024 * 1024   # per-step activation budget (keeps pipeline 2-deep)
TARGET_LANES = 32768                 # lane-tile target for step-overhead amortisation


def _round_up(v, m):
    return (v + m - 1) // m * m


def _inception_kernel(x_ref, wf_ref, wblk_ref, o_ref, *, L, Lp, c1p, c2p):
    lanes = x_ref.shape[-1]
    x = x_ref[...]                                        # (in_cp, lanes), f32

    # Lane position within each length-Lp batch segment (batch folded into
    # lanes).  Validity masks for every halo offset, built once per step.
    pos = lax.broadcasted_iota(jnp.int32, (1, lanes), 1) % Lp
    masks = {d: jnp.logical_and(pos + d >= 0, pos + d < L)
             for d in (-2, -1, 1, 2)}

    def sh(v, d, fill):
        # In-register halo shift: XLU lane rotate + VPU select.
        # shifted[..., q] == v[..., q + d] where 0 <= pos+d < L, else `fill`.
        r = pltpu.roll(v, shift=(-d) % lanes, axis=1)
        return jnp.where(masks[d], r, fill)

    # Branch-3 pre-stage: MaxPool1d(kernel=3, stride=1, padding=1) on x.
    neg_inf = jnp.float32(-jnp.inf)
    pooled = jnp.maximum(jnp.maximum(sh(x, -1, neg_inf), x), sh(x, 1, neg_inf))

    # Fused 1x1 convs (branch-1/2 bottlenecks + shortcut) as ONE matmul.
    # The constant-1 row baked into x supplies b11 / b21 on the bottleneck
    # rows and the three branch-conv biases on the shortcut rows.
    h = jnp.dot(wf_ref[...], x, preferred_element_type=jnp.float32)
    h1 = h[0:c1p, :]                                      # (c1p, lanes)  (+ b11)
    h2 = h[c1p:c1p + c2p, :]                              # (c2p, lanes)  (+ b21)
    sc = h[c1p + c2p:, :]                                 # shortcut + conv biases

    # Single block-diagonal im2col matmul for all three branch convs; result
    # rows are already in [p1 | p2 | p3] padded order.
    zero = jnp.float32(0.0)
    stacked = jnp.concatenate(
        [sh(h1, -1, zero), h1, sh(h1, 1, zero),                      # k=3 conv
         sh(h2, -2, zero), sh(h2, -1, zero), h2,
         sh(h2, 1, zero), sh(h2, 2, zero),                           # k=5 conv
         sh(pooled, -1, zero), pooled, sh(pooled, 1, zero)],         # k=3 conv
        axis=0)                                           # (Kc, lanes)

    out = jnp.dot(wblk_ref[...], stacked, preferred_element_type=jnp.float32)
    o_ref[...] = (out + sc).astype(o_ref.dtype)           # single aligned store


def _full_spec(arr):
    nd = arr.ndim
    return pl.BlockSpec(arr.shape, lambda i, _n=nd: (0,) * _n)


def _choose_btile(N, Lp, bytes_per_lane):
    """Batch elements folded into lanes per grid step.

    Largest divisor of N whose lane tile fits the per-step VMEM budget and
    the overhead-amortisation target, while keeping >= 2 grid steps whenever
    N >= 2 (so the "parallel" axis can shard across v7x's two TensorCores).
    """
    cap_lanes = max(Lp, VMEM_TILE_BUDGET // max(bytes_per_lane, 1))
    best = 1
    for d in range(1, N + 1):
        if N % d:
            continue
        lanes = d * Lp
        if lanes > cap_lanes or lanes > TARGET_LANES:
            break
        if N >= 2 and N // d < 2:
            break
        best = d
    return best


def _im2col_w(w, coutp, cinp):
    """(cout, cin, K) conv weight -> (coutp, K*cinp), column layout t*cinp+i."""
    cout, cin, K = w.shape
    wp = jnp.zeros((coutp, cinp, K), w.dtype).at[:cout, :cin, :].set(w)
    return jnp.transpose(wp, (0, 2, 1)).reshape(coutp, K * cinp)


def _prepare(params, in_c, c1, c2, c3, out_C):
    """Host-side weight fusion / im2col reshapes / channel padding to 8."""
    (w11, b11, w12, b12, w21, b21, w22, b22, w3, b3, ws) = params
    in_cp = _round_up(in_c + 1, SUBLANE)      # +1: constant-1 bias row slot
    c1p = _round_up(c1, SUBLANE)
    c2p = _round_up(c2, SUBLANE)
    c3p = _round_up(c3, SUBLANE)
    out_rows_p = c1p + c2p + c3p

    # Fused 1x1 GEMM weights: rows = [branch-1 bottleneck | branch-2
    # bottleneck | shortcut-in-padded-[p1|p2|p3]-layout]; column `in_c` is the
    # bias column (multiplied by the constant-1 row of x).
    rows_wf = c1p + c2p + out_rows_p
    wf = jnp.zeros((rows_wf, in_cp), jnp.float32)
    wf = wf.at[0:c1, 0:in_c].set(w11[:, :, 0])
    wf = wf.at[0:c1, in_c].set(b11[:, 0])
    wf = wf.at[c1p:c1p + c2, 0:in_c].set(w21[:, :, 0])
    wf = wf.at[c1p:c1p + c2, in_c].set(b21[:, 0])
    base = c1p + c2p
    ws2 = ws[:, :, 0]
    wf = wf.at[base:base + c1, 0:in_c].set(ws2[0:c1])
    wf = wf.at[base + c1p:base + c1p + c2, 0:in_c].set(ws2[c1:c1 + c2])
    wf = wf.at[base + c1p + c2p:base + c1p + c2p + c3, 0:in_c].set(ws2[c1 + c2:out_C])
    # Branch-conv biases folded onto the shortcut rows (added after the
    # block-diagonal conv matmul via `+ sc`).
    wf = wf.at[base:base + c1, in_c].set(b12[:, 0])
    wf = wf.at[base + c1p:base + c1p + c2, in_c].set(b22[:, 0])
    wf = wf.at[base + c1p + c2p:base + c1p + c2p + c3, in_c].set(b3[:, 0])

    # Block-diagonal im2col weights: one matmul covers all three branch convs.
    W1 = _im2col_w(w12, c1p, c1p)             # (c1p, 3*c1p)
    W2 = _im2col_w(w22, c2p, c2p)             # (c2p, 5*c2p)
    W3 = _im2col_w(w3, c3p, in_cp)            # (c3p, 3*in_cp)
    Kc = 3 * c1p + 5 * c2p + 3 * in_cp
    wblk = jnp.zeros((out_rows_p, Kc), jnp.float32)
    wblk = wblk.at[0:c1p, 0:3 * c1p].set(W1)
    wblk = wblk.at[c1p:c1p + c2p, 3 * c1p:3 * c1p + 5 * c2p].set(W2)
    wblk = wblk.at[c1p + c2p:, 3 * c1p + 5 * c2p:].set(W3)

    return (wf, wblk), (in_cp, c1p, c2p, c3p, out_rows_p, Kc)


def inception_forward(x, params):
    (w11, b11, w12, b12, w21, b21, w22, b22, w3, b3, ws) = params
    N, in_c, L = x.shape
    c1, c2, c3 = w11.shape[0], w21.shape[0], w3.shape[0]
    out_C = ws.shape[0]
    assert out_C == c1 + c2 + c3, "`out += short_cut(x)` needs out_C == c1+c2+c3"

    (wf, wblk), (in_cp, c1p, c2p, c3p, out_rows_p, Kc) = _prepare(
        params, in_c, c1, c2, c3, out_C)

    # Fold batch into lanes with L padded to a multiple of 128 and a
    # constant-1 bias row: (N, C, L) -> (in_cp, N*Lp).
    # NOTE: in a stacked model keep activations in this folded layout between
    # blocks so the boundary transposes are paid once, not per block.
    Lp = _round_up(L, LANE)
    x_p = jnp.zeros((N, in_cp, Lp), jnp.float32)
    x_p = x_p.at[:, 0:in_c, 0:L].set(x)
    x_p = x_p.at[:, in_c, :].set(1.0)
    x_f = jnp.transpose(x_p, (1, 0, 2)).reshape(in_cp, N * Lp)

    # Lane-tile sizing from an explicit VMEM budget (double-buffered in/out
    # blocks + fused-1x1 result + pooled + im2col stack + roll temporaries).
    rows_live = (2 * in_cp + 2 * out_rows_p
                 + (c1p + c2p + out_rows_p)
                 + 2 * in_cp
                 + 2 * Kc
                 + out_rows_p)
    bt = _choose_btile(N, Lp, 4 * rows_live)
    n_tiles = N // bt
    lanes = bt * Lp

    kernel = functools.partial(_inception_kernel, L=L, Lp=Lp, c1p=c1p, c2p=c2p)

    grid_spec = pltpu.PrefetchScalarGridSpec(
        num_scalar_prefetch=0,
        grid=(n_tiles,),
        in_specs=[pl.BlockSpec((in_cp, lanes), lambda i: (0, i)),
                  _full_spec(wf), _full_spec(wblk)],
        out_specs=pl.BlockSpec((out_rows_p, lanes), lambda i: (0, i)),
    )

    out_f = pl.pallas_call(
        kernel,
        out_shape=jax.ShapeDtypeStruct((out_rows_p, N * Lp), jnp.float32),
        grid_spec=grid_spec,
        compiler_params=pltpu.CompilerParams(
            dimension_semantics=("parallel",),
            vmem_limit_bytes=VMEM_LIMIT),
    )(x_f, wf, wblk)

    # (out_rows_p, N*Lp) -> (N, out_rows_p, Lp), strip channel/length padding.
    out_p = jnp.transpose(out_f.reshape(out_rows_p, N, Lp), (1, 0, 2))
    out = jnp.concatenate([out_p[:, 0:c1, 0:L],
                           out_p[:, c1p:c1p + c2, 0:L],
                           out_p[:, c1p + c2p:c1p + c2p + c3, 0:L]], axis=1)
    return out


def init_params(key, in_c, c1, c2, c3, out_C):
    ks = jax.random.split(key, 11)
    w = lambda k, s: (0.1 * jax.random.normal(k, s, jnp.float32))
    w11, b11 = w(ks[0], (c1, in_c, 1)), w(ks[1], (c1, 1))
    w12, b12 = w(ks[2], (c1, c1, 3)), w(ks[3], (c1, 1))
    w21, b21 = w(ks[4], (c2, in_c, 1)), w(ks[5], (c2, 1))
    w22, b22 = w(ks[6], (c2, c2, 5)), w(ks[7], (c2, 1))
    w3, b3 = w(ks[8], (c3, in_c, 3)), w(ks[9], (c3, 1))
    if in_c != out_C:
        ws = w(ks[10], (out_C, in_c, 1))
    else:
        # short_cut is identity; identity 1x1 weights reproduce it exactly.
        ws = jnp.eye(in_c, dtype=jnp.float32)[:, :, None]
    return (w11, b11, w12, b12, w21, b21, w22, b22, w3, b3, ws)


def ref_forward(x, params):
    """Pure-JAX reference (matches PyTorch Conv1d / MaxPool1d semantics)."""
    (w11, b11, w12, b12, w21, b21, w22, b22, w3, b3, ws) = params
    in_c = x.shape[1]
    out_C = ws.shape[0]

    def conv(v, w_, b_, pad):
        y = lax.conv_general_dilated(v, w_, window_strides=(1,),
                                     padding=[(pad, pad)],
                                     dimension_numbers=("NCH", "OIH", "NCH"))
        if b_ is not None:
            y = y + b_.reshape(1, -1, 1)
        return y

    p1 = conv(conv(x, w11, b11, 0), w12, b12, 1)
    p2 = conv(conv(x, w21, b21, 0), w22, b22, 2)
    pooled = lax.reduce_window(x, -jnp.inf, lax.max, (1, 1, 3), (1, 1, 1),
                               [(0, 0), (0, 0), (1, 1)])
    p3 = conv(pooled, w3, b3, 1)
    out = jnp.concatenate([p1, p2, p3], axis=1)
    sc = x if in_c == out_C else conv(x, ws, None, 0)
    return out + sc


if __name__ == "__main__":
    # Small shapes consistent with the module: Conv1d -> x is (N, C, L).
    N, in_c, L = 2, 4, 16
    c1, c2, c3 = 4, 4, 4
    out_C = c1 + c2 + c3  # required by `out += short_cut(x)` in forward()

    key = jax.random.PRNGKey(0)
    kx, kp = jax.random.split(key)
    x = jax.random.normal(kx, (N, in_c, L), jnp.float32)
    params = init_params(kp, in_c, c1, c2, c3, out_C)

    out = inception_forward(x, params)
    out = jax.block_until_ready(out)

    expected = ref_forward(x, params)
    assert out.shape == (N, out_C, L), out.shape
    assert jnp.allclose(out, expected, atol=1e-5, rtol=1e-5), (
        float(jnp.max(jnp.abs(out - expected))))
    print("KERNEL_OK")
</pallas_src>

<mosaic_0001>
module attributes {stable_mosaic.version = 11 : i64} {
  func.func @_inception_kernel(%arg0: i32, %arg1: memref<8x128xf32, #tpu.memory_space<vmem>>, %arg2: memref<40x8xf32, #tpu.memory_space<vmem>>, %arg3: memref<24x88xf32, #tpu.memory_space<vmem>>, %arg4: memref<24x128xf32, #tpu.memory_space<vmem>>) attributes {dimension_semantics = [#tpu.dimension_semantics<parallel>], iteration_bounds = array<i64: 2>, scalar_prefetch = 0 : i64, scratch_operands = 0 : i64, tpu.core_type = #tpu.core_type<tc>, window_params = [{transform_indices = @transform_0, window_bounds = array<i64: 8, 128>}, {pipeline_mode = #tpu.pipeline_mode<synchronous>, transform_indices = @transform_1, window_bounds = array<i64: 40, 8>}, {pipeline_mode = #tpu.pipeline_mode<synchronous>, transform_indices = @transform_2, window_bounds = array<i64: 24, 88>}, {transform_indices = @transform_3, window_bounds = array<i64: 24, 128>}]} {
    %c0 = arith.constant 0 : index
    %c0_0 = arith.constant 0 : index
    %0 = vector.load %arg1[%c0, %c0_0] : memref<8x128xf32, #tpu.memory_space<vmem>>, vector<8x128xf32>
    %1 = tpu.iota {dimensions = array<i32: 1>} : vector<1x128xi32>
    %c128_i32 = arith.constant 128 : i32
    %c0_i32 = arith.constant 0 : i32
    %2 = arith.cmpi eq, %c128_i32, %c0_i32 : i32
    %c1_i32 = arith.constant 1 : i32
    %3 = arith.select %2, %c1_i32, %c128_i32 : i32
    %4 = vector.broadcast %3 : i32 to vector<1x128xi32>
    %5 = arith.remsi %1, %4 : vector<1x128xi32>
    %c0_i32_1 = arith.constant 0 : i32
    %6 = vector.broadcast %c0_i32_1 : i32 to vector<1x128xi32>
    %7 = arith.cmpi ne, %5, %6 : vector<1x128xi32>
    %c0_i32_2 = arith.constant 0 : i32
    %8 = vector.broadcast %c0_i32_2 : i32 to vector<1x128xi32>
    %9 = arith.cmpi slt, %5, %8 : vector<1x128xi32>
    %c0_i32_3 = arith.constant 0 : i32
    %10 = arith.cmpi slt, %3, %c0_i32_3 : i32
    %11 = vector.broadcast %10 : i1 to vector<1x128xi1>
    %12 = vector.broadcast %11 : vector<1x128xi1> to vector<1x128xi1>
    %13 = arith.xori %9, %12 : vector<1x128xi1>
    %14 = arith.andi %13, %7 : vector<1x128xi1>
    %15 = vector.broadcast %3 : i32 to vector<1x128xi32>
    %16 = arith.addi %5, %15 : vector<1x128xi32>
    %17 = arith.select %14, %16, %5 : vector<1x128xi1>, vector<1x128xi32>
    %c-2_i32 = arith.constant -2 : i32
    %18 = vector.broadcast %c-2_i32 : i32 to vector<1x128xi32>
    %19 = arith.addi %17, %18 : vector<1x128xi32>
    %c0_i32_4 = arith.constant 0 : i32
    %20 = vector.broadcast %c0_i32_4 : i32 to vector<1x128xi32>
    %21 = arith.cmpi sge, %19, %20 : vector<1x128xi32>
    %c-2_i32_5 = arith.constant -2 : i32
    %22 = vector.broadcast %c-2_i32_5 : i32 to vector<1x128xi32>
    %23 = arith.addi %17, %22 : vector<1x128xi32>
    %c16_i32 = arith.constant 16 : i32
    %24 = vector.broadcast %c16_i32 : i32 to vector<1x128xi32>
    %25 = arith.cmpi slt, %23, %24 : vector<1x128xi32>
    %26 = arith.andi %21, %25 : vector<1x128xi1>
    %c-1_i32 = arith.constant -1 : i32
    %27 = vector.broadcast %c-1_i32 : i32 to vector<1x128xi32>
    %28 = arith.addi %17, %27 : vector<1x128xi32>
    %c0_i32_6 = arith.constant 0 : i32
    %29 = vector.broadcast %c0_i32_6 : i32 to vector<1x128xi32>
    %30 = arith.cmpi sge, %28, %29 : vector<1x128xi32>
    %c-1_i32_7 = arith.constant -1 : i32
    %31 = vector.broadcast %c-1_i32_7 : i32 to vector<1x128xi32>
    %32 = arith.addi %17, %31 : vector<1x128xi32>
    %c16_i32_8 = arith.constant 16 : i32
    %33 = vector.broadcast %c16_i32_8 : i32 to vector<1x128xi32>
    %34 = arith.cmpi slt, %32, %33 : vector<1x128xi32>
    %35 = arith.andi %30, %34 : vector<1x128xi1>
    %c1_i32_9 = arith.constant 1 : i32
    %36 = vector.broadcast %c1_i32_9 : i32 to vector<1x128xi32>
    %37 = arith.addi %17, %36 : vector<1x128xi32>
    %c0_i32_10 = arith.constant 0 : i32
    %38 = vector.broadcast %c0_i32_10 : i32 to vector<1x128xi32>
    %39 = arith.cmpi sge, %37, %38 : vector<1x128xi32>
    %c1_i32_11 = arith.constant 1 : i32
    %40 = vector.broadcast %c1_i32_11 : i32 to vector<1x128xi32>
    %41 = arith.addi %17, %40 : vector<1x128xi32>
    %c16_i32_12 = arith.constant 16 : i32
    %42 = vector.broadcast %c16_i32_12 : i32 to vector<1x128xi32>
    %43 = arith.cmpi slt, %41, %42 : vector<1x128xi32>
    %44 = arith.andi %39, %43 : vector<1x128xi1>
    %c2_i32 = arith.constant 2 : i32
    %45 = vector.broadcast %c2_i32 : i32 to vector<1x128xi32>
    %46 = arith.addi %17, %45 : vector<1x128xi32>
    %c0_i32_13 = arith.constant 0 : i32
    %47 = vector.broadcast %c0_i32_13 : i32 to vector<1x128xi32>
    %48 = arith.cmpi sge, %46, %47 : vector<1x128xi32>
    %c2_i32_14 = arith.constant 2 : i32
    %49 = vector.broadcast %c2_i32_14 : i32 to vector<1x128xi32>
    %50 = arith.addi %17, %49 : vector<1x128xi32>
    %c16_i32_15 = arith.constant 16 : i32
    %51 = vector.broadcast %c16_i32_15 : i32 to vector<1x128xi32>
    %52 = arith.cmpi slt, %50, %51 : vector<1x128xi32>
    %53 = arith.andi %48, %52 : vector<1x128xi1>
    %c1_i32_16 = arith.constant 1 : i32
    %54 = tpu.dynamic_rotate %0 by %c1_i32_16 dim 1 : vector<8x128xf32>, i32 -> vector<8x128xf32>
    %cst = arith.constant 0xFF800000 : f32
    %55 = vector.shape_cast %35 : vector<1x128xi1> to vector<1x128xi1>
    %56 = vector.broadcast %55 : vector<1x128xi1> to vector<8x128xi1>
    %57 = vector.broadcast %cst : f32 to vector<8x128xf32>
    %58 = arith.select %56, %54, %57 : vector<8x128xi1>, vector<8x128xf32>
    %59 = arith.maximumf %58, %0 : vector<8x128xf32>
    %c127_i32 = arith.constant 127 : i32
    %60 = tpu.dynamic_rotate %0 by %c127_i32 dim 1 : vector<8x128xf32>, i32 -> vector<8x128xf32>
    %cst_17 = arith.constant 0xFF800000 : f32
    %61 = vector.shape_cast %44 : vector<1x128xi1> to vector<1x128xi1>
    %62 = vector.broadcast %61 : vector<1x128xi1> to vector<8x128xi1>
    %63 = vector.broadcast %cst_17 : f32 to vector<8x128xf32>
    %64 = arith.select %62, %60, %63 : vector<8x128xi1>, vector<8x128xf32>
    %65 = arith.maximumf %59, %64 : vector<8x128xf32>
    %c0_18 = arith.constant 0 : index
    %c0_19 = arith.constant 0 : index
    %66 = vector.load %arg2[%c0_18, %c0_19] : memref<40x8xf32, #tpu.memory_space<vmem>>, vector<40x8xf32>
    %cst_20 = arith.constant dense<0.000000e+00> : vector<40x128xf32>
    %67 = tpu.matmul %66, %0, %cst_20 {dimension_numbers = #tpu.dot_dimension_numbers<[1], [0], [0], [1], [0, 0, 1, 1], [], []>} : vector<40x8xf32>, vector<8x128xf32>, vector<40x128xf32> -> vector<40x128xf32>
    %68 = vector.extract_strided_slice %67 {offsets = [0, 0], sizes = [8, 128], strides = [1, 1]} : vector<40x128xf32> to vector<8x128xf32>
    %69 = vector.extract_strided_slice %67 {offsets = [8, 0], sizes = [8, 128], strides = [1, 1]} : vector<40x128xf32> to vector<8x128xf32>
    %70 = vector.extract_strided_slice %67 {offsets = [16, 0], sizes = [24, 128], strides = [1, 1]} : vector<40x128xf32> to vector<24x128xf32>
    %c1_i32_21 = arith.constant 1 : i32
    %71 = tpu.dynamic_rotate %68 by %c1_i32_21 dim 1 : vector<8x128xf32>, i32 -> vector<8x128xf32>
    %cst_22 = arith.constant 0.000000e+00 : f32
    %72 = vector.shape_cast %35 : vector<1x128xi1> to vector<1x128xi1>
    %73 = vector.broadcast %72 : vector<1x128xi1> to vector<8x128xi1>
    %74 = vector.broadcast %cst_22 : f32 to vector<8x128xf32>
    %75 = arith.select %73, %71, %74 : vector<8x128xi1>, vector<8x128xf32>
    %c127_i32_23 = arith.constant 127 : i32
    %76 = tpu.dynamic_rotate %68 by %c127_i32_23 dim 1 : vector<8x128xf32>, i32 -> vector<8x128xf32>
    %cst_24 = arith.constant 0.000000e+00 : f32
    %77 = vector.shape_cast %44 : vector<1x128xi1> to vector<1x128xi1>
    %78 = vector.broadcast %77 : vector<1x128xi1> to vector<8x128xi1>
    %79 = vector.broadcast %cst_24 : f32 to vector<8x128xf32>
    %80 = arith.select %78, %76, %79 : vector<8x128xi1>, vector<8x128xf32>
    %c2_i32_25 = arith.constant 2 : i32
    %81 = tpu.dynamic_rotate %69 by %c2_i32_25 dim 1 : vector<8x128xf32>, i32 -> vector<8x128xf32>
    %cst_26 = arith.constant 0.000000e+00 : f32
    %82 = vector.shape_cast %26 : vector<1x128xi1> to vector<1x128xi1>
    %83 = vector.broadcast %82 : vector<1x128xi1> to vector<8x128xi1>
    %84 = vector.broadcast %cst_26 : f32 to vector<8x128xf32>
    %85 = arith.select %83, %81, %84 : vector<8x128xi1>, vector<8x128xf32>
    %c1_i32_27 = arith.constant 1 : i32
    %86 = tpu.dynamic_rotate %69 by %c1_i32_27 dim 1 : vector<8x128xf32>, i32 -> vector<8x128xf32>
    %cst_28 = arith.constant 0.000000e+00 : f32
    %87 = vector.shape_cast %35 : vector<1x128xi1> to vector<1x128xi1>
    %88 = vector.broadcast %87 : vector<1x128xi1> to vector<8x128xi1>
    %89 = vector.broadcast %cst_28 : f32 to vector<8x128xf32>
    %90 = arith.select %88, %86, %89 : vector<8x128xi1>, vector<8x128xf32>
    %c127_i32_29 = arith.constant 127 : i32
    %91 = tpu.dynamic_rotate %69 by %c127_i32_29 dim 1 : vector<8x128xf32>, i32 -> vector<8x128xf32>
    %cst_30 = arith.constant 0.000000e+00 : f32
    %92 = vector.shape_cast %44 : vector<1x128xi1> to vector<1x128xi1>
    %93 = vector.broadcast %92 : vector<1x128xi1> to vector<8x128xi1>
    %94 = vector.broadcast %cst_30 : f32 to vector<8x128xf32>
    %95 = arith.select %93, %91, %94 : vector<8x128xi1>, vector<8x128xf32>
    %c126_i32 = arith.constant 126 : i32
    %96 = tpu.dynamic_rotate %69 by %c126_i32 dim 1 : vector<8x128xf32>, i32 -> vector<8x128xf32>
    %cst_31 = arith.constant 0.000000e+00 : f32
    %97 = vector.shape_cast %53 : vector<1x128xi1> to vector<1x128xi1>
    %98 = vector.broadcast %97 : vector<1x128xi1> to vector<8x128xi1>
    %99 = vector.broadcast %cst_31 : f32 to vector<8x128xf32>
    %100 = arith.select %98, %96, %99 : vector<8x128xi1>, vector<8x128xf32>
    %c1_i32_32 = arith.constant 1 : i32
    %101 = tpu.dynamic_rotate %65 by %c1_i32_32 dim 1 : vector<8x128xf32>, i32 -> vector<8x128xf32>
    %cst_33 = arith.constant 0.000000e+00 : f32
    %102 = vector.shape_cast %35 : vector<1x128xi1> to vector<1x128xi1>
    %103 = vector.broadcast %102 : vector<1x128xi1> to vector<8x128xi1>
    %104 = vector.broadcast %cst_33 : f32 to vector<8x128xf32>
    %105 = arith.select %103, %101, %104 : vector<8x128xi1>, vector<8x128xf32>
    %c127_i32_34 = arith.constant 127 : i32
    %106 = tpu.dynamic_rotate %65 by %c127_i32_34 dim 1 : vector<8x128xf32>, i32 -> vector<8x128xf32>
    %cst_35 = arith.constant 0.000000e+00 : f32
    %107 = vector.shape_cast %44 : vector<1x128xi1> to vector<1x128xi1>
    %108 = vector.broadcast %107 : vector<1x128xi1> to vector<8x128xi1>
    %109 = vector.broadcast %cst_35 : f32 to vector<8x128xf32>
    %110 = arith.select %108, %106, %109 : vector<8x128xi1>, vector<8x128xf32>
    %111 = tpu.concatenate %75, %68, %80, %85, %90, %69, %95, %100, %105, %65, %110 in 0 : vector<8x128xf32>, vector<8x128xf32>, vector<8x128xf32>, vector<8x128xf32>, vector<8x128xf32>, vector<8x128xf32>, vector<8x128xf32>, vector<8x128xf32>, vector<8x128xf32>, vector<8x128xf32>, vector<8x128xf32> -> vector<88x128xf32>
    %c0_36 = arith.constant 0 : index
    %c0_37 = arith.constant 0 : index
    %112 = vector.load %arg3[%c0_36, %c0_37] : memref<24x88xf32, #tpu.memory_space<vmem>>, vector<24x88xf32>
    %cst_38 = arith.constant dense<0.000000e+00> : vector<24x128xf32>
    %113 = tpu.matmul %112, %111, %cst_38 {dimension_numbers = #tpu.dot_dimension_numbers<[1], [0], [0], [1], [0, 0, 1, 1], [], []>} : vector<24x88xf32>, vector<88x128xf32>, vector<24x128xf32> -> vector<24x128xf32>
    %114 = arith.addf %113, %70 : vector<24x128xf32>
    %c0_39 = arith.constant 0 : index
    %c0_40 = arith.constant 0 : index
    %115 = vector.load %arg4[%c0_39, %c0_40] : memref<24x128xf32, #tpu.memory_space<vmem>>, vector<24x128xf32>
    tpu.vector_store %arg4[%c0_39, %c0_40], %114 {strides = array<i32>} : memref<24x128xf32, #tpu.memory_space<vmem>>, vector<24x128xf32>,
    return
  }
  func.func @transform_0(%arg0: i32) -> (i32, i32) {
    %c0_i32 = arith.constant 0 : i32
    %c0_i32_0 = arith.constant 0 : i32
    return %c0_i32, %arg0 : i32, i32
  }
  func.func @transform_1(%arg0: i32) -> (i32, i32) {
    %c0_i32 = arith.constant 0 : i32
    %c0_i32_0 = arith.constant 0 : i32
    %c0_i32_1 = arith.constant 0 : i32
    return %c0_i32, %c0_i32_0 : i32, i32
  }
  func.func @transform_2(%arg0: i32) -> (i32, i32) {
    %c0_i32 = arith.constant 0 : i32
    %c0_i32_0 = arith.constant 0 : i32
    %c0_i32_1 = arith.constant 0 : i32
    return %c0_i32, %c0_i32_0 : i32, i32
  }
  func.func @transform_3(%arg0: i32) -> (i32, i32) {
    %c0_i32 = arith.constant 0 : i32
    %c0_i32_0 = arith.constant 0 : i32
    return %c0_i32, %arg0 : i32, i32
  }
}

</mosaic_0001>

<bundles_post_ra>
// kernel: tpu_custom_call.1
= control target key start
LH: loop header
LB: loop body
LE: loop exit
PB: predicated region body
PF: predicated region fallthrough
CT: control target
= control target key end

     0   :  { %8 = vsyncpa [#allocation3], 0  ;;  %s1000_s0 = inlined_call_operand.vmem [shape: f32[8,256], index: 0, kind: input, shape index: {}]   ;;  %s1001_s1 = inlined_call_operand.vmem [shape: f32[40,8], index: 1, kind: input, shape index: {}]   ;;  %s1002_s2 = inlined_call_operand.vmem [shape: f32[24,88], index: 2, kind: input, shape index: {}]   ;;  %s1003_s3 = inlined_call_operand.hbm [shape: f32[24,256], index: 3, kind: output, shape index: {}]  }
   0x1   :  { %10 = vsyncpa [#allocation3 + $0x1], 0  ;;  %s794_s12 = smov 0   ;;  %s796_s13 = smov 0  }
   0x2   :  { %s798_s14 = smov 0   ;;  %s800_s15 = smov 0  }
   0x3 LB: > { %s815_s16 = sadd.s32 4294967295, %s760_s15   ;;  %s519_s17 = sadd.s32 4294967294, %s760_s15   ;;  %s760_s15 = sphi %s800_s15, %s1013_s15   ;;  %s756_s14 = sphi %s798_s14, %s1012_s14   ;;  %s752_s13 = sphi %s796_s13, %s1011_s13   ;;  %s748_s12 = sphi %s794_s12, %s1010_s12  }
   0x4   : > { %s819_s18 = sadd.s32 1, %s760_s15   ;;  %s91_s19 = sadd.s32 1, %s756_s14 }
   0x5   : > { %s88_s20 = ssub.s32 %s760_s15, %s819_s18  ;;  %p101_p0 = scmp.ne.s32.totalorder %s756_s14, %s752_s13 }
   0x6   : > { %p89_p1 = scmp.eq.s32.totalorder %s88_s20, 0  ;;  %p102_p2 = scmp.eq.s32.totalorder %s815_s16, 1 }
   0x7   : > { %p107_p3 = scmp.ne.s32.totalorder %s752_s13, %s748_s12  ;;  %p108_p4 = scmp.eq.s32.totalorder %s519_s17, 1 }
   0x8   : > { %s830_s21 = scalar_select %p89_p1, %s756_s14, %s91_s19  }
   0x9   : > { %p832_p5 = por %p102_p2, %p101_p0  ;;  %p836_p6 = por %p108_p4, %p107_p3 }
   0xa   : > { %p522_p7 = scmp.ge.s32.totalorder %s760_s15, 1  ;;  %p139_p8 = scmp.lt.s32.totalorder %s760_s15, 3 }
   0xc   : > { %p140_p9 = pnand %p522_p7, %p139_p8 }
   0xd   : > { %p162_p10 = scmp.lt.s32.totalorder (!%p140_p9), %s815_s16, 1  ;;  %v762_v0 = vmov (!%p140_p9), 0.0   ;;  %vm763_vm0 = vmmov (!%p140_p9), 0   ;;  %v209_v1 = vld [vmem:[%s1001_s1] sm:$0xff] (!%p140_p9)  ;;  %vm214_vm1 = vcmask (!%p140_p9), 64512   ;;  %s764_s4 = smov (!%p140_p9), 1   ;;  %v167_v4 = vlaneseq (!%p140_p9) }
   0xe   : > { %143 = sbr.rel (%p140_p9) target bundleno = 611 (0x263), region = 32  ;;  %563 = vmatprep.subr.mxu0 (!%p140_p9), %v762_v0  ;;  %565 = vmatprep.mubr.msk.f32.mxu0 (!%p140_p9), %vm763_vm0, %v762_v0  ;;  %v210_v3 = vld [vmem:[%s1001_s1 + $0x8] sm:$0xff] (!%p140_p9)  ;;  %s765_s7 = smov (!%p140_p9), 127   ;;  %v766_v6 = vmov (!%p140_p9), 0.0|0.0   ;;  %v211_v9 = vld [vmem:[%s1001_s1 + $0x10] sm:$0xff] (!%p140_p9)  ;;  %v212_v15 = vld [vmem:[%s1001_s1 + $0x18] sm:$0xff] (!%p140_p9) }
   0xf   : > { %605 = vmatprep.mubr.msk.f32.mxu1 (!%p140_p9), %vm763_vm0, %v762_v0  ;;  %v168_v5 = vand.u32 (!%p140_p9), 127, %v167_v4  ;;  %631 = vmatprep.subr.bf16.mxu1 (!%p140_p9), %v766_v6  ;;  %s767_s17 = smov (!%p140_p9), 2   ;;  %v213_v21 = vld [vmem:[%s1001_s1 + $0x20] sm:$0xff] (!%p140_p9)  ;;  %vm769_vm8 = vmmov (!%p140_p9), 1   ;;  %vm351_vm14 = vcmask (!%p140_p9), 719872   ;;  %v349_v39 = vld [vmem:[%s1002_s2 + $0x8] sm:$0xff] (!%p140_p9) }
  0x10   : > { %v348_v38 = vld [vmem:[%s1002_s2] sm:$0xff] (!%p140_p9)  ;;  %v350_v41 = vld [vmem:[%s1002_s2 + $0x10] sm:$0xff] (!%p140_p9)  ;;  %s540_s8 = sshll.u32 (!%p140_p9), %s815_s16, 7 }
  0x11   : > { %v185_v7 = vadd.s32 (!%p140_p9), 4294967295, %v168_v5  ;;  %v875_v11 = vadd.s32 (!%p140_p9), 1, %v168_v5  ;;  %v181_v23 = vadd.s32 (!%p140_p9), 4294967294, %v168_v5  ;;  %v193_v30 = vadd.s32 (!%p140_p9), 2, %v168_v5  ;;  %s957_s11 = scalar_lea.hbm (!%p140_p9), %s1003_s3, %s540_s8 }
  0x13   : > { %vm186_vm2 = vcmp.ge.s32.totalorder (!%p140_p9), %v185_v7, 0  ;;  %vm187_vm3 = vcmp.lt.s32.totalorder (!%p140_p9), %v185_v7, 16  ;;  %vm191_vm5 = vcmp.lt.s32.totalorder (!%p140_p9), %v875_v11, 16  ;;  %vm182_vm6 = vcmp.ge.s32.totalorder (!%p140_p9), %v181_v23, 0 }
  0x14   : > { %vm871_vm4 = vmand (!%p140_p9), %vm186_vm2, %vm187_vm3  ;;  %vm183_vm7 = vcmp.lt.s32.totalorder (!%p140_p9), %v181_v23, 16  ;;  %vm195_vm12 = vcmp.lt.s32.totalorder (!%p140_p9), %v193_v30, 16 }
  0x15   : > { %s163_s24 = scalar_select %p162_p10, %s815_s16, 1  ;;  %vm905_vm9 = vmpackc.low %vm769_vm8, %vm871_vm4 }
  0x16   : > { %vm184_vm10 = vmand %vm182_vm6, %vm183_vm7  ;;  %s770_s16 = smov [#allocation2]  }
  0x17   : > { %s523_s25 = sshll.u32 %s163_s24, 3  ;;  %s768_s24 = smov 126   ;;  %vm617_vm11 = vmpackc.low %vm184_vm10, %vm191_vm5 }
  0x18   : > { %s165_s28 = scalar_lea.vmem %s1000_s0, %s523_s25  ;;  %vm625_vm13 = vmpackc.low %vm195_vm12, %vm191_vm5  ;;  %s702_s20 = sshll.u32 %s770_s16, 4  ;;  %s703_s20 = int_to_ptr.vmem [resolvable:$false] %s702_s20 }
  0x19   : > { %v166_v2 = vld [vmem:[%s165_s28] sm:$0xff] }
  0x1a   : > { %564 = vmatpush3.msra.mxu0 %v166_v2  ;;  %197 = vrot.lane.b32.xlu0 %v166_v2, %s764_s4 }
  0x1b   : > { %566 = vmatmul.mubr.msk.f32.vlgmr.msra.gmra.mrb[0].mxu0 %vm214_vm1, %v209_v1  ;;  %611 = vmatprep.subr.bf16.mxu0 %v766_v6 }
  0x1c   : > { %568 = vmatprep.mubr.msk.f32.mxu0 %vm763_vm0, %v762_v0 }
  0x1e   : > { %203 = vrot.lane.b32.xlu0 %v166_v2, %s765_s7 }
  0x1f   : > { %569 = vmatmul.mubr.msk.f32.gmra.mrb[2].mxu0 %vm214_vm1, %v210_v3 }
  0x20   : > { %571 = vmatprep.mubr.msk.f32.mxu0 %vm763_vm0, %v762_v0 }
  0x23   : > { %572 = vmatmul.mubr.msk.f32.gmra.mrb[4].mxu0 %vm214_vm1, %v211_v9 }
  0x24   : > { %574 = vmatprep.mubr.msk.f32.mxu0 %vm763_vm0, %v762_v0 }
  0x27   : > { %575 = vmatmul.mubr.msk.f32.gmra.mrb[6].mxu0 %vm214_vm1, %v212_v15 }
  0x28   : > { %577 = vmatprep.mubr.msk.f32.mxu0 %vm763_vm0, %v762_v0 }
  0x2b   : > { %578 = vmatmul.mubr.msk.f32.gmra.mrb[8].mxu0 %vm214_vm1, %v213_v21 }
  0x2c   : > { %602 = vmatprep.mubr.msk.f32.mxu0 %vm763_vm0, %v762_v0 }
  0x8c   : > { %v198_v8 = vpop.permute.xlu0 %197 }
  0x8d   : > { %v201_v14 = vsel %vm871_vm4, %v198_v8, -inf }
  0x8e   : > { %v202_v18 = vmax.f32 %v201_v14, %v166_v2 }
  0x90   : > { %v204_v16 = vpop.permute.xlu0 %203 }
  0x91   : > { %v207_v20 = vsel %vm191_vm5, %v204_v16, -inf }
  0x92   : > { %v208_v22 = vmax.f32 %v202_v18, %v207_v20 }
  0xee   : > { %v296_v12 = vpop.f32.mrb[0].mxu0 }
  0xef   : > { %320 = vrot.lane.b32.xlu1 %v296_v12, %s764_s4  ;;  %v567_v13 = vpop.f32.mrb[1].mxu0 }
  0xf2   : > { %v301_v17 = vpop.f32.mrb[2].mxu0 }
  0xf3   : > { %323 = vrot.lane.b32.xlu1 %v296_v12, %s765_s7  ;;  %326 = vrot.lane.b32.xlu0 %v301_v17, %s767_s17  ;;  %v570_v19 = vpop.f32.mrb[3].mxu0 }
  0xf7   : > { %331 = vrot.lane.b32.xlu1 %v301_v17, %s764_s4  ;;  %334 = vrot.lane.b32.xlu0 %v301_v17, %s765_s7 }
  0xfa   : > { %v311_v42 = vpop.f32.mrb[6].mxu0 }
  0xfb   : > { %337 = vrot.lane.b32.xlu1 %v301_v17, %s768_s24  ;;  %342 = vrot.lane.b32.xlu0 %v208_v22, %s764_s4  ;;  %v576_v43 = vpop.f32.mrb[7].mxu0  ;;  %s159_s4 = sand.u32 1, %s752_s13   ;;  %s704_s24 = scalar_lea.vmem %s703_s20, 768 }
  0xfc   : > { %s647_s5 = smul.u32 24, %s159_s4  ;;  %s959_s17 = scalar_lea.sflag [#allocation3], %s159_s4 }
  0xfe   : > { %v316_v44 = vpop.f32.mrb[8].mxu0  ;;  %s161_s6 = scalar_lea.vmem [#allocation2], %s647_s5 }
  0xff   : > { %345 = vrot.lane.b32.xlu1 %v208_v22, %s765_s7  ;;  %v579_v45 = vpop.f32.mrb[9].mxu0  ;;  %s457_s7 = sshll.u32 %s161_s6, 4  ;;  %s952_s7 = int_to_ptr.vmem [resolvable:$true] %s457_s7 }
 0x100   : > { %s698_s19 = scalar_lea.vmem %s952_s7, 384  ;;  %p705_p0 = scmp.lt.s32.totalorder %s952_s7, %s703_s20 }
 0x101   : > { %p699_p11 = scmp.ne.s32.totalorder %s952_s7, %s698_s19  ;;  %p706_p1 = scmp.lt.s32.totalorder %s704_s24, %s698_s19 }
 0x103   : > { %p700_p12 = pnand %p699_p11, %p832_p5  ;;  %p707_p2 = por %p706_p1, %p705_p0 }
 0x105   : > { %p701_p13 = pneg %p700_p12 }
 0x107   : > { %p708_p3 = pnand %p707_p2, %p701_p13 }
 0x161   : > { %v321_v25 = vpop.permute.xlu1 %320 }
 0x162   : > { %v612_v26 = vpack.c.bf16 %v296_v12, %v321_v25 }
 0x164   : > { %614 = vmatpush3.bf16.msk.msra.mxu0 %vm905_vm9, %v612_v26  ;;  %637 = vmatpush3.bf16.msk.msra.mxu1 %vm905_vm9, %v612_v26 }
 0x165   : > { %v324_v27 = vpop.permute.xlu1 %323  ;;  %v327_v28 = vpop.permute.xlu0 %326  ;;  %615 = vmatprep.subr.bf16.mxu0 %v766_v6  ;;  %632 = vmatprep.subr.bf16.mxu1 %v766_v6 }
 0x166   : > { %v616_v29 = vpack.c.bf16 %v327_v28, %v324_v27 }
 0x168   : > { %618 = vmatpush3.bf16.msk.msra.mxu0 %vm617_vm11, %v616_v29  ;;  %638 = vmatpush3.bf16.msk.msra.mxu1 %vm617_vm11, %v616_v29 }
 0x169   : > { %v332_v31 = vpop.permute.xlu1 %331  ;;  %v335_v32 = vpop.permute.xlu0 %334  ;;  %619 = vmatprep.subr.bf16.mxu0 %v766_v6  ;;  %633 = vmatprep.subr.bf16.mxu1 %v766_v6 }
 0x16a   : > { %v620_v33 = vpack.c.bf16 %v301_v17, %v332_v31 }
 0x16c   : > { %622 = vmatpush3.bf16.msk.msra.mxu0 %vm905_vm9, %v620_v33  ;;  %639 = vmatpush3.bf16.msk.msra.mxu1 %vm905_vm9, %v620_v33 }
 0x16d   : > { %v338_v34 = vpop.permute.xlu1 %337  ;;  %623 = vmatprep.subr.bf16.mxu0 %v766_v6  ;;  %634 = vmatprep.subr.bf16.mxu1 %v766_v6  ;;  %v343_v36 = vpop.permute.xlu0 %342 }
 0x16e   : > { %v624_v35 = vpack.c.bf16 %v338_v34, %v335_v32  ;;  %v628_v37 = vpack.c.bf16 %v208_v22, %v343_v36 }
 0x170   : > { %626 = vmatpush3.bf16.msk.msra.mxu0 %vm625_vm13, %v624_v35  ;;  %640 = vmatpush3.bf16.msk.msra.mxu1 %vm625_vm13, %v624_v35 }
 0x171   : > { %627 = vmatprep.subr.bf16.mxu0 %v766_v6  ;;  %635 = vmatprep.subr.bf16.mxu1 %v766_v6  ;;  %v346_v40 = vpop.permute.xlu1 %345 }
 0x174   : > { %630 = vmatpush3.bf16.msk.msra.mxu0 %vm905_vm9, %v628_v37  ;;  %641 = vmatpush3.bf16.msk.msra.mxu1 %vm905_vm9, %v628_v37 }
 0x175   : > { %600 = vmatprep.subr.mxu0 %v762_v0  ;;  %636 = vmatprep.subr.mxu1 %v762_v0 }
 0x178   : > { %601 = vmatpush3.msk.msra.mxu0 %vm191_vm5, %v346_v40  ;;  %642 = vmatpush3.msk.msra.mxu1 %vm191_vm5, %v346_v40 }
 0x179   : > { %603 = vmatmul.mubr.msk.f32.vlgmr.msra.gmra.mrb[4].mxu0 %vm351_vm14, %v348_v38  ;;  %606 = vmatmul.mubr.msk.f32.vlgmr.msra.gmra.mrb[0].mxu1 %vm351_vm14, %v349_v39 }
 0x17a   : > { %608 = vmatprep.mubr.msk.f32.mxu1 %vm763_vm0, %v762_v0 }
 0x17d   : > { %609 = vmatmul.mubr.msk.f32.gmra.mrb[2].mxu1 %vm351_vm14, %v350_v41 }
 0x24c   : > { %v427_v46 = vpop.f32.mrb[4].mxu0  ;;  %v432_v47 = vpop.f32.mrb[0].mxu1 }
 0x24d   : > { %441 = vst [vmem:[%s161_s6] sm:$0xff] %v427_v46  ;;  %v433_v48 = vadd.f32 %v432_v47, %v311_v42  ;;  %v604_v49 = vpop.f32.mrb[5].mxu0  ;;  %v607_v50 = vpop.f32.mrb[1].mxu1 }
 0x24f   : > { %442 = vst [vmem:[%s161_s6 + $0x8] sm:$0xff] %v433_v48 }
 0x250   : > { %v437_v51 = vpop.f32.mrb[2].mxu1 }
 0x251   : > { %v438_v52 = vadd.f32 %v437_v51, %v316_v44  ;;  %v610_v53 = vpop.f32.mrb[3].mxu1 }
 0x253   : > { %443 = vst [vmem:[%s161_s6 + $0x10] sm:$0xff] %v438_v52 }
 0x254   : > { %711 = shalt.err (!%p708_p3)
}
 0x255   : > { %s712_s25 = scalar_lea.hbm %s957_s11, 384  ;;  %s716_s28 = scalar_lea.hbm %s1003_s3, 768 }
 0x256   : > { %p713_p4 = scmp.ne.s32.totalorder %s957_s11, %s712_s25  ;;  %p717_p9 = scmp.lt.u32.totalorder %s957_s11, %s1003_s3 }
 0x257   : > { %p718_p10 = scmp.lt.u32.totalorder %s716_s28, %s712_s25  ;;  %p720_p12 = scmp.lt.u32.totalorder %s712_s25, %s957_s11 }
 0x258   : > { %p714_p7 = pnand %p713_p4, %p832_p5 }
 0x259   : > { %p719_p11 = por %p718_p10, %p717_p9 }
 0x25a   : > { %p715_p8 = pneg %p714_p7 }
 0x25b   : > { %p721_p13 = por %p720_p12, %p719_p11 }
 0x25d   : > { %p722_p0 = pnand %p721_p13, %p715_p8 }
 0x25f   : > { %725 = shalt.err (!%p722_p0)
}
 0x260   : > { %s771_s4 = smov 128   ;;  %s772_s5 = smov 256  }
 0x261   : > { %s773_s6 = smov 8  }
 0x262   : > { %648 = dma.vmem_to_hbm [thread:$0]  (%p832_p5), %s952_s7, 384, %s957_s11, %s959_s17, %s771_s4, %s772_s5, %s773_s6  }
 0x263 PF: > { %p654_p1 = scmp.ge.s32.totalorder %s760_s15, 2  ;;  %s472_s8 = sand.u32 1, %s748_s12  }
 0x264   : > { %s473_s9 = scalar_lea.sflag [#allocation3], %s472_s8 }
 0x265   : > { %p651_p2 = pnand %p654_p1, %p836_p6 }
 0x267   : > { %743 = dma.done.wait (!%p651_p2), %s473_s9, 384  }
 0x268   : > { %745 = vsyncadd (!%p651_p2), %s473_s9, 4294966912  ;;  %p13_p3 = scmp.ge.s32.totalorder %s819_s18, 4   ;;  %s1010_s12 = smov %s752_s13 }
 0x269   : > { %s1011_s13 = smov %s756_s14  ;;  %s1012_s14 = smov %s830_s21 }
 0x26a   : > { %s1013_s15 = smov %s819_s18  ;;  %15 = sbr.rel (!%p13_p3) target bundleno = 3 (0x3), region = 67 }
 0x271   :  { %478 = vsyncpa [#allocation3], 1 }
 0x272   :  { %480 = vsyncpa [#allocation3 + $0x1], 1 }

</bundles_post_ra>
